<compile_context>
chip_gen: v6e
topology: v6e:2x2x1
jax: 0.10.0
libtpu: 0.0.40
codegen_flags: <defaults>
</compile_context>

<pallas_src>
import jax
import jax.numpy as jnp
from jax.experimental import pallas as pl
from jax.experimental.pallas import tpu as pltpu


def _round_up(x, m):
    return ((x + m - 1) // m) * m


# ---------------------------------------------------------------------------
# Kernel body: the whole 3-layer MLP fused (3 matmuls + bias adds + 2 ReLUs).
# ---------------------------------------------------------------------------
def _make_mlp_kernel(compute_dtype):
    def cast(a):
        return a if compute_dtype is None else a.astype(compute_dtype)

    def kernel(x_ref, w1_ref, b1_ref, w2_ref, b2_ref, w3_ref, b3_ref, o_ref):
        # x: (TN, D)   w1: (D, Hp)   w2: (Hp, Hp)   w3: (Hp, D)
        # biases: (1, Hp) / (1, Hp) / (1, D)        out: (TN, D)
        x = cast(x_ref[...])
        b1 = b1_ref[...].astype(jnp.float32)
        b2 = b2_ref[...].astype(jnp.float32)
        b3 = b3_ref[...].astype(jnp.float32)

        h1 = jnp.dot(x, cast(w1_ref[...]), preferred_element_type=jnp.float32) + b1
        h1 = jnp.maximum(h1, 0.0)

        h2 = jnp.dot(cast(h1), cast(w2_ref[...]),
                     preferred_element_type=jnp.float32) + b2
        h2 = jnp.maximum(h2, 0.0)

        out = jnp.dot(cast(h2), cast(w3_ref[...]),
                      preferred_element_type=jnp.float32) + b3
        o_ref[...] = out.astype(o_ref.dtype)

    return kernel


# ---------------------------------------------------------------------------
# Spec helpers.
# ---------------------------------------------------------------------------
def _single_buffered_const_spec(shape):
    # Full-array block, same block every grid step -> VMEM-resident, single-buffered.
    return pl.BlockSpec(shape, lambda i: (0, 0), pipeline_mode=pl.Buffered(1))


def _double_buffered_const_spec(shape):
    return pl.BlockSpec(shape, lambda i: (0, 0))


def _vmem_limit_bytes():
    # Generation-aware VMEM budget: ~3/4 of physical (128 MiB on v5e/v6e, 64 MiB on
    # v7x), capped at 100 MiB, never below the 32 MiB scoped default.
    try:
        cap = int(pltpu.get_tpu_info().vmem_capacity_bytes)
    except Exception:
        cap = 64 * 1024 * 1024  # conservative (v7x) fallback
    return max(32 * 1024 * 1024, min(100 * 1024 * 1024, (cap * 3) // 4))


# ---------------------------------------------------------------------------
# One-time parameter preparation (hoisted out of the forward path).
# ---------------------------------------------------------------------------
def prepare_params(params, *, lane_multiple=128):
    """Zero-pad the hidden dim to a lane multiple ONCE.

    Zero-padded weight columns/rows + zero biases keep the padded hidden lanes exactly
    0 through bias-add and ReLU, so the real output columns are bit-identical.
    """
    w1, b1, w2, b2, w3, b3 = params
    D, H = w1.shape
    # TODO(synk): on v6e/v7x with large tunable H, round Hp to 256 to fill the
    #             256-wide MXU output dimension (128 already saturates v5e).
    Hp = _round_up(H, lane_multiple)
    ph = Hp - H
    b1 = b1.reshape(1, H)
    b2 = b2.reshape(1, H)
    b3 = b3.reshape(1, D)
    if ph == 0:
        return (w1, b1, w2, b2, w3, b3)
    return (
        jnp.pad(w1, ((0, 0), (0, ph))),
        jnp.pad(b1, ((0, 0), (0, ph))),
        jnp.pad(w2, ((0, ph), (0, ph))),
        jnp.pad(b2, ((0, 0), (0, ph))),
        jnp.pad(w3, ((0, ph), (0, 0))),
        b3,
    )


# ---------------------------------------------------------------------------
# Forward wrapper.
# ---------------------------------------------------------------------------
def denoising_score_matching_forward(x, params, *, batch_tile=1024, matmul_dtype=None):
    """Fused MLP forward.  x: [N, D].

    `params` should come from prepare_params() (padding hoisted out of the hot path);
    raw params are accepted and padded on the fly as a fallback.
    `matmul_dtype=jnp.bfloat16` optionally runs the MXU operands in bf16 (f32 accum).
    Note: output dtype follows x.dtype (bf16 x with f32 params truncates the result).
    """
    N, D = x.shape
    w1, b1, w2, b2, w3, b3 = params
    if (w1.shape[1] % 128 != 0) or b1.ndim != 2:
        w1, b1, w2, b2, w3, b3 = prepare_params(params)
    Hp = w1.shape[1]
    assert w1.shape[0] == D and w3.shape == (Hp, D)

    # Dtype-aware sublane granule: 8 rows f32, 16 bf16, 32 for 1-byte dtypes.
    sub = max(8, 32 // jnp.dtype(x.dtype).itemsize)

    # Adaptive batch tiling: spread N over the minimum number of <= batch_tile steps so
    # padding waste is < sub rows per step (never round N up to a full large tile).
    num_steps = -(-N // max(batch_tile, sub))
    tile = _round_up(-(-N // num_steps), sub)
    Np = tile * num_steps

    xp = x if Np == N else jnp.pad(x, ((0, Np - N), (0, 0)))

    itemsize = jnp.dtype(x.dtype).itemsize
    param_bytes = sum(int(a.size) * jnp.dtype(a.dtype).itemsize
                      for a in (w1, b1, w2, b2, w3, b3))
    cost = pl.CostEstimate(
        flops=2 * Np * (D * Hp + Hp * Hp + Hp * D),
        transcendentals=0,
        bytes_accessed=int(2 * Np * D * itemsize + param_bytes),
    )

    def build(const_spec):
        return pl.pallas_call(
            _make_mlp_kernel(matmul_dtype),
            out_shape=jax.ShapeDtypeStruct((Np, D), x.dtype),
            grid_spec=pltpu.PrefetchScalarGridSpec(
                num_scalar_prefetch=0,
                grid=(num_steps,),
                in_specs=[
                    pl.BlockSpec((tile, D), lambda i: (i, 0)),  # x tile, natural width
                    const_spec((D, Hp)),   # w1
                    const_spec((1, Hp)),   # b1
                    const_spec((Hp, Hp)),  # w2
                    const_spec((1, Hp)),   # b2
                    const_spec((Hp, D)),   # w3
                    const_spec((1, D)),    # b3
                ],
                out_specs=pl.BlockSpec((tile, D), lambda i: (i, 0)),
            ),
            compiler_params=pltpu.CompilerParams(
                dimension_semantics=("parallel",),
                vmem_limit_bytes=_vmem_limit_bytes(),
            ),
            cost_estimate=cost,
        )

    try:
        out = build(_single_buffered_const_spec)(xp, w1, b1, w2, b2, w3, b3)
    except Exception:
        # Fallback for jax versions that reject pipeline_mode / Buffered(1).
        out = build(_double_buffered_const_spec)(xp, w1, b1, w2, b2, w3, b3)

    return out if Np == N else out[:N]


# ---------------------------------------------------------------------------
# Init + reference (pure JAX) for the demo.
# ---------------------------------------------------------------------------
def init_params(key, input_dim, hidden_dim):
    """Deterministic init mimicking torch.nn.Linear defaults (U[-1/sqrt(fan_in), +])."""
    ks = jax.random.split(key, 6)

    def linear(kw, kb, fan_in, fan_out):
        bound = 1.0 / jnp.sqrt(fan_in)
        w = jax.random.uniform(kw, (fan_in, fan_out), jnp.float32, -bound, bound)
        b = jax.random.uniform(kb, (1, fan_out), jnp.float32, -bound, bound)
        return w, b

    w1, b1 = linear(ks[0], ks[1], input_dim, hidden_dim)
    w2, b2 = linear(ks[2], ks[3], hidden_dim, hidden_dim)
    w3, b3 = linear(ks[4], ks[5], hidden_dim, input_dim)
    return (w1, b1, w2, b2, w3, b3)


def _reference_forward(x, params):
    w1, b1, w2, b2, w3, b3 = params
    h1 = jnp.maximum(x @ w1 + b1, 0.0)
    h2 = jnp.maximum(h1 @ w2 + b2, 0.0)
    return h2 @ w3 + b3


if __name__ == "__main__":
    input_dim = 16
    hidden_dim = 32

    key = jax.random.PRNGKey(0)
    kx1, kx2, kx3, kp = jax.random.split(key, 4)
    raw_params = init_params(kp, input_dim, hidden_dim)
    params = prepare_params(raw_params)  # one-time padding, hoisted out of forward

    # Small batch (single grid step, no padding anywhere).
    x_small = jax.random.normal(kx1, (8, input_dim), jnp.float32)
    out_small = jax.block_until_ready(
        denoising_score_matching_forward(x_small, params))
    ref_small = _reference_forward(x_small, raw_params)
    assert out_small.shape == (8, input_dim)
    assert jnp.allclose(out_small, ref_small, atol=1e-5, rtol=1e-5)

    # Larger batch with a small explicit tile (exercises the multi-step grid).
    x_large = jax.random.normal(kx2, (384, input_dim), jnp.float32)
    out_large = jax.block_until_ready(
        denoising_score_matching_forward(x_large, params, batch_tile=128))
    ref_large = _reference_forward(x_large, raw_params)
    assert out_large.shape == (384, input_dim)
    assert jnp.allclose(out_large, ref_large, atol=1e-5, rtol=1e-5)

    # Ragged batch (exercises adaptive tile + minimal batch padding + final slice).
    x_ragged = jax.random.normal(kx3, (200, input_dim), jnp.float32)
    out_ragged = jax.block_until_ready(
        denoising_score_matching_forward(x_ragged, params, batch_tile=128))
    ref_ragged = _reference_forward(x_ragged, raw_params)
    assert out_ragged.shape == (200, input_dim)
    assert jnp.allclose(out_ragged, ref_ragged, atol=1e-5, rtol=1e-5)

    print("KERNEL_OK")
</pallas_src>

<mosaic_0001>
module attributes {stable_mosaic.version = 11 : i64} {
  func.func @kernel(%arg0: i32, %arg1: memref<8x16xf32, #tpu.memory_space<vmem>>, %arg2: memref<16x128xf32, #tpu.memory_space<vmem>>, %arg3: memref<1x128xf32, #tpu.memory_space<vmem>>, %arg4: memref<128x128xf32, #tpu.memory_space<vmem>>, %arg5: memref<1x128xf32, #tpu.memory_space<vmem>>, %arg6: memref<128x16xf32, #tpu.memory_space<vmem>>, %arg7: memref<1x16xf32, #tpu.memory_space<vmem>>, %arg8: memref<8x16xf32, #tpu.memory_space<vmem>>) attributes {dimension_semantics = [#tpu.dimension_semantics<parallel>], iteration_bounds = array<i64: 1>, scalar_prefetch = 0 : i64, scratch_operands = 0 : i64, tpu.core_type = #tpu.core_type<tc>, window_params = [{transform_indices = @transform_0, window_bounds = array<i64: 8, 16>}, {pipeline_mode = #tpu.pipeline_mode<synchronous>, transform_indices = @transform_1, window_bounds = array<i64: 16, 128>}, {pipeline_mode = #tpu.pipeline_mode<synchronous>, transform_indices = @transform_2, window_bounds = array<i64: 1, 128>}, {pipeline_mode = #tpu.pipeline_mode<synchronous>, transform_indices = @transform_3, window_bounds = array<i64: 128, 128>}, {pipeline_mode = #tpu.pipeline_mode<synchronous>, transform_indices = @transform_4, window_bounds = array<i64: 1, 128>}, {pipeline_mode = #tpu.pipeline_mode<synchronous>, transform_indices = @transform_5, window_bounds = array<i64: 128, 16>}, {pipeline_mode = #tpu.pipeline_mode<synchronous>, transform_indices = @transform_6, window_bounds = array<i64: 1, 16>}, {transform_indices = @transform_7, window_bounds = array<i64: 8, 16>}]} {
    %c0 = arith.constant 0 : index
    %c0_0 = arith.constant 0 : index
    %0 = vector.load %arg1[%c0, %c0_0] : memref<8x16xf32, #tpu.memory_space<vmem>>, vector<8x16xf32>
    %c0_1 = arith.constant 0 : index
    %c0_2 = arith.constant 0 : index
    %1 = vector.load %arg3[%c0_1, %c0_2] : memref<1x128xf32, #tpu.memory_space<vmem>>, vector<1x128xf32>
    %c0_3 = arith.constant 0 : index
    %c0_4 = arith.constant 0 : index
    %2 = vector.load %arg5[%c0_3, %c0_4] : memref<1x128xf32, #tpu.memory_space<vmem>>, vector<1x128xf32>
    %c0_5 = arith.constant 0 : index
    %c0_6 = arith.constant 0 : index
    %3 = vector.load %arg7[%c0_5, %c0_6] : memref<1x16xf32, #tpu.memory_space<vmem>>, vector<1x16xf32>
    %c0_7 = arith.constant 0 : index
    %c0_8 = arith.constant 0 : index
    %4 = vector.load %arg2[%c0_7, %c0_8] : memref<16x128xf32, #tpu.memory_space<vmem>>, vector<16x128xf32>
    %cst = arith.constant dense<0.000000e+00> : vector<8x128xf32>
    %5 = tpu.matmul %0, %4, %cst {dimension_numbers = #tpu.dot_dimension_numbers<[1], [0], [0], [1], [0, 0, 1, 1], [], []>} : vector<8x16xf32>, vector<16x128xf32>, vector<8x128xf32> -> vector<8x128xf32>
    %6 = vector.broadcast %1 : vector<1x128xf32> to vector<8x128xf32>
    %7 = arith.addf %5, %6 : vector<8x128xf32>
    %cst_9 = arith.constant 0.000000e+00 : f32
    %8 = vector.broadcast %cst_9 : f32 to vector<8x128xf32>
    %9 = arith.maximumf %7, %8 : vector<8x128xf32>
    %c0_10 = arith.constant 0 : index
    %c0_11 = arith.constant 0 : index
    %10 = vector.load %arg4[%c0_10, %c0_11] : memref<128x128xf32, #tpu.memory_space<vmem>>, vector<128x128xf32>
    %cst_12 = arith.constant dense<0.000000e+00> : vector<8x128xf32>
    %11 = tpu.matmul %9, %10, %cst_12 {dimension_numbers = #tpu.dot_dimension_numbers<[1], [0], [0], [1], [0, 0, 1, 1], [], []>} : vector<8x128xf32>, vector<128x128xf32>, vector<8x128xf32> -> vector<8x128xf32>
    %12 = vector.broadcast %2 : vector<1x128xf32> to vector<8x128xf32>
    %13 = arith.addf %11, %12 : vector<8x128xf32>
    %cst_13 = arith.constant 0.000000e+00 : f32
    %14 = vector.broadcast %cst_13 : f32 to vector<8x128xf32>
    %15 = arith.maximumf %13, %14 : vector<8x128xf32>
    %c0_14 = arith.constant 0 : index
    %c0_15 = arith.constant 0 : index
    %16 = vector.load %arg6[%c0_14, %c0_15] : memref<128x16xf32, #tpu.memory_space<vmem>>, vector<128x16xf32>
    %cst_16 = arith.constant dense<0.000000e+00> : vector<8x16xf32>
    %17 = tpu.matmul %15, %16, %cst_16 {dimension_numbers = #tpu.dot_dimension_numbers<[1], [0], [0], [1], [0, 0, 1, 1], [], []>} : vector<8x128xf32>, vector<128x16xf32>, vector<8x16xf32> -> vector<8x16xf32>
    %18 = vector.broadcast %3 : vector<1x16xf32> to vector<8x16xf32>
    %19 = arith.addf %17, %18 : vector<8x16xf32>
    %c0_17 = arith.constant 0 : index
    %c0_18 = arith.constant 0 : index
    %20 = vector.load %arg8[%c0_17, %c0_18] : memref<8x16xf32, #tpu.memory_space<vmem>>, vector<8x16xf32>
    tpu.vector_store %arg8[%c0_17, %c0_18], %19 {strides = array<i32>} : memref<8x16xf32, #tpu.memory_space<vmem>>, vector<8x16xf32>,
    return
  }
  func.func @transform_0(%arg0: i32) -> (i32, i32) {
    %c0_i32 = arith.constant 0 : i32
    %c0_i32_0 = arith.constant 0 : i32
    return %arg0, %c0_i32 : i32, i32
  }
  func.func @transform_1(%arg0: i32) -> (i32, i32) {
    %c0_i32 = arith.constant 0 : i32
    %c0_i32_0 = arith.constant 0 : i32
    %c0_i32_1 = arith.constant 0 : i32
    return %c0_i32, %c0_i32_0 : i32, i32
  }
  func.func @transform_2(%arg0: i32) -> (i32, i32) {
    %c0_i32 = arith.constant 0 : i32
    %c0_i32_0 = arith.constant 0 : i32
    %c0_i32_1 = arith.constant 0 : i32
    return %c0_i32, %c0_i32_0 : i32, i32
  }
  func.func @transform_3(%arg0: i32) -> (i32, i32) {
    %c0_i32 = arith.constant 0 : i32
    %c0_i32_0 = arith.constant 0 : i32
    %c0_i32_1 = arith.constant 0 : i32
    return %c0_i32, %c0_i32_0 : i32, i32
  }
  func.func @transform_4(%arg0: i32) -> (i32, i32) {
    %c0_i32 = arith.constant 0 : i32
    %c0_i32_0 = arith.constant 0 : i32
    %c0_i32_1 = arith.constant 0 : i32
    return %c0_i32, %c0_i32_0 : i32, i32
  }
  func.func @transform_5(%arg0: i32) -> (i32, i32) {
    %c0_i32 = arith.constant 0 : i32
    %c0_i32_0 = arith.constant 0 : i32
    %c0_i32_1 = arith.constant 0 : i32
    return %c0_i32, %c0_i32_0 : i32, i32
  }
  func.func @transform_6(%arg0: i32) -> (i32, i32) {
    %c0_i32 = arith.constant 0 : i32
    %c0_i32_0 = arith.constant 0 : i32
    %c0_i32_1 = arith.constant 0 : i32
    return %c0_i32, %c0_i32_0 : i32, i32
  }
  func.func @transform_7(%arg0: i32) -> (i32, i32) {
    %c0_i32 = arith.constant 0 : i32
    %c0_i32_0 = arith.constant 0 : i32
    return %arg0, %c0_i32 : i32, i32
  }
}

module attributes {stable_mosaic.version = 11 : i64} {
  func.func @kernel(%arg0: i32, %arg1: memref<8x16xf32, #tpu.memory_space<vmem>>, %arg2: memref<16x128xf32, #tpu.memory_space<vmem>>, %arg3: memref<1x128xf32, #tpu.memory_space<vmem>>, %arg4: memref<128x128xf32, #tpu.memory_space<vmem>>, %arg5: memref<1x128xf32, #tpu.memory_space<vmem>>, %arg6: memref<128x16xf32, #tpu.memory_space<vmem>>, %arg7: memref<1x16xf32, #tpu.memory_space<vmem>>, %arg8: memref<8x16xf32, #tpu.memory_space<vmem>>) attributes {dimension_semantics = [#tpu.dimension_semantics<parallel>], iteration_bounds = array<i64: 1>, scalar_prefetch = 0 : i64, scratch_operands = 0 : i64, tpu.core_type = #tpu.core_type<tc>, window_params = [{transform_indices = @transform_0, window_bounds = array<i64: 8, 16>}, {pipeline_mode = #tpu.pipeline_mode<synchronous>, transform_indices = @transform_1, window_bounds = array<i64: 16, 128>}, {pipeline_mode = #tpu.pipeline_mode<synchronous>, transform_indices = @transform_2, window_bounds = array<i64: 1, 128>}, {pipeline_mode = #tpu.pipeline_mode<synchronous>, transform_indices = @transform_3, window_bounds = array<i64: 128, 128>}, {pipeline_mode = #tpu.pipeline_mode<synchronous>, transform_indices = @transform_4, window_bounds = array<i64: 1, 128>}, {pipeline_mode = #tpu.pipeline_mode<synchronous>, transform_indices = @transform_5, window_bounds = array<i64: 128, 16>}, {pipeline_mode = #tpu.pipeline_mode<synchronous>, transform_indices = @transform_6, window_bounds = array<i64: 1, 16>}, {transform_indices = @transform_7, window_bounds = array<i64: 8, 16>}]} {
    %c0 = arith.constant 0 : index
    %c0_0 = arith.constant 0 : index
    %0 = vector.load %arg1[%c0, %c0_0] : memref<8x16xf32, #tpu.memory_space<vmem>>, vector<8x16xf32>
    %c0_1 = arith.constant 0 : index
    %c0_2 = arith.constant 0 : index
    %1 = vector.load %arg3[%c0_1, %c0_2] : memref<1x128xf32, #tpu.memory_space<vmem>>, vector<1x128xf32>
    %c0_3 = arith.constant 0 : index
    %c0_4 = arith.constant 0 : index
    %2 = vector.load %arg5[%c0_3, %c0_4] : memref<1x128xf32, #tpu.memory_space<vmem>>, vector<1x128xf32>
    %c0_5 = arith.constant 0 : index
    %c0_6 = arith.constant 0 : index
    %3 = vector.load %arg7[%c0_5, %c0_6] : memref<1x16xf32, #tpu.memory_space<vmem>>, vector<1x16xf32>
    %c0_7 = arith.constant 0 : index
    %c0_8 = arith.constant 0 : index
    %4 = vector.load %arg2[%c0_7, %c0_8] : memref<16x128xf32, #tpu.memory_space<vmem>>, vector<16x128xf32>
    %cst = arith.constant dense<0.000000e+00> : vector<8x128xf32>
    %5 = tpu.matmul %0, %4, %cst {dimension_numbers = #tpu.dot_dimension_numbers<[1], [0], [0], [1], [0, 0, 1, 1], [], []>} : vector<8x16xf32>, vector<16x128xf32>, vector<8x128xf32> -> vector<8x128xf32>
    %6 = vector.broadcast %1 : vector<1x128xf32> to vector<8x128xf32>
    %7 = arith.addf %5, %6 : vector<8x128xf32>
    %cst_9 = arith.constant 0.000000e+00 : f32
    %8 = vector.broadcast %cst_9 : f32 to vector<8x128xf32>
    %9 = arith.maximumf %7, %8 : vector<8x128xf32>
    %c0_10 = arith.constant 0 : index
    %c0_11 = arith.constant 0 : index
    %10 = vector.load %arg4[%c0_10, %c0_11] : memref<128x128xf32, #tpu.memory_space<vmem>>, vector<128x128xf32>
    %cst_12 = arith.constant dense<0.000000e+00> : vector<8x128xf32>
    %11 = tpu.matmul %9, %10, %cst_12 {dimension_numbers = #tpu.dot_dimension_numbers<[1], [0], [0], [1], [0, 0, 1, 1], [], []>} : vector<8x128xf32>, vector<128x128xf32>, vector<8x128xf32> -> vector<8x128xf32>
    %12 = vector.broadcast %2 : vector<1x128xf32> to vector<8x128xf32>
    %13 = arith.addf %11, %12 : vector<8x128xf32>
    %cst_13 = arith.constant 0.000000e+00 : f32
    %14 = vector.broadcast %cst_13 : f32 to vector<8x128xf32>
    %15 = arith.maximumf %13, %14 : vector<8x128xf32>
    %c0_14 = arith.constant 0 : index
    %c0_15 = arith.constant 0 : index
    %16 = vector.load %arg6[%c0_14, %c0_15] : memref<128x16xf32, #tpu.memory_space<vmem>>, vector<128x16xf32>
    %cst_16 = arith.constant dense<0.000000e+00> : vector<8x16xf32>
    %17 = tpu.matmul %15, %16, %cst_16 {dimension_numbers = #tpu.dot_dimension_numbers<[1], [0], [0], [1], [0, 0, 1, 1], [], []>} : vector<8x128xf32>, vector<128x16xf32>, vector<8x16xf32> -> vector<8x16xf32>
    %18 = vector.broadcast %3 : vector<1x16xf32> to vector<8x16xf32>
    %19 = arith.addf %17, %18 : vector<8x16xf32>
    %c0_17 = arith.constant 0 : index
    %c0_18 = arith.constant 0 : index
    %20 = vector.load %arg8[%c0_17, %c0_18] : memref<8x16xf32, #tpu.memory_space<vmem>>, vector<8x16xf32>
    tpu.vector_store %arg8[%c0_17, %c0_18], %19 {strides = array<i32>} : memref<8x16xf32, #tpu.memory_space<vmem>>, vector<8x16xf32>,
    return
  }
  func.func @transform_0(%arg0: i32) -> (i32, i32) {
    %c0_i32 = arith.constant 0 : i32
    %c0_i32_0 = arith.constant 0 : i32
    return %arg0, %c0_i32 : i32, i32
  }
  func.func @transform_1(%arg0: i32) -> (i32, i32) {
    %c0_i32 = arith.constant 0 : i32
    %c0_i32_0 = arith.constant 0 : i32
    %c0_i32_1 = arith.constant 0 : i32
    return %c0_i32, %c0_i32_0 : i32, i32
  }
  func.func @transform_2(%arg0: i32) -> (i32, i32) {
    %c0_i32 = arith.constant 0 : i32
    %c0_i32_0 = arith.constant 0 : i32
    %c0_i32_1 = arith.constant 0 : i32
    return %c0_i32, %c0_i32_0 : i32, i32
  }
  func.func @transform_3(%arg0: i32) -> (i32, i32) {
    %c0_i32 = arith.constant 0 : i32
    %c0_i32_0 = arith.constant 0 : i32
    %c0_i32_1 = arith.constant 0 : i32
    return %c0_i32, %c0_i32_0 : i32, i32
  }
  func.func @transform_4(%arg0: i32) -> (i32, i32) {
    %c0_i32 = arith.constant 0 : i32
    %c0_i32_0 = arith.constant 0 : i32
    %c0_i32_1 = arith.constant 0 : i32
    return %c0_i32, %c0_i32_0 : i32, i32
  }
  func.func @transform_5(%arg0: i32) -> (i32, i32) {
    %c0_i32 = arith.constant 0 : i32
    %c0_i32_0 = arith.constant 0 : i32
    %c0_i32_1 = arith.constant 0 : i32
    return %c0_i32, %c0_i32_0 : i32, i32
  }
  func.func @transform_6(%arg0: i32) -> (i32, i32) {
    %c0_i32 = arith.constant 0 : i32
    %c0_i32_0 = arith.constant 0 : i32
    %c0_i32_1 = arith.constant 0 : i32
    return %c0_i32, %c0_i32_0 : i32, i32
  }
  func.func @transform_7(%arg0: i32) -> (i32, i32) {
    %c0_i32 = arith.constant 0 : i32
    %c0_i32_0 = arith.constant 0 : i32
    return %arg0, %c0_i32 : i32, i32
  }
}

</mosaic_0001>

<bundles_post_ra>
// kernel: tpu_custom_call.1
= control target key start
LH: loop header
LB: loop body
LE: loop exit
PB: predicated region body
PF: predicated region fallthrough
CT: control target
= control target key end

     0   :  { %12 = vsyncpa [#allocation3], 0  ;;  %s696_s0 = inlined_call_operand.hbm [shape: f32[8,16], index: 0, kind: input, shape index: {}]   ;;  %s697_s1 = inlined_call_operand.vmem [shape: f32[16,128], index: 1, kind: input, shape index: {}]   ;;  %s698_s2 = inlined_call_operand.vmem [shape: f32[1,128], index: 2, kind: input, shape index: {}]   ;;  %s699_s3 = inlined_call_operand.vmem [shape: f32[128,128], index: 3, kind: input, shape index: {}]   ;;  %s700_s4 = inlined_call_operand.vmem [shape: f32[1,128], index: 4, kind: input, shape index: {}]   ;;  %s701_s5 = inlined_call_operand.vmem [shape: f32[128,16], index: 5, kind: input, shape index: {}]   ;;  %s702_s6 = inlined_call_operand.vmem [shape: f32[1,16], index: 6, kind: input, shape index: {}]   ;;  %s703_s7 = inlined_call_operand.hbm [shape: f32[8,16], index: 7, kind: output, shape index: {}]  }
   0x1   :  { %13 = vsyncpa [#allocation4], 0  ;;  %s493_s24 = smov [#allocation2]  }
   0x2   :  { %s20_s25 = sshll.u32 %s493_s24, 4  ;;  %s21_s25 = int_to_ptr.vmem [resolvable:$true] %s20_s25 }
   0x3   :  { %s457_s26 = scalar_lea.vmem %s21_s25, 128  ;;  %p462_p1 = scmp.lt.s32.totalorder %s21_s25, %s21_s25 }
   0x4   :  { %p458_p0 = scmp.ne.s32.totalorder %s21_s25, %s457_s26  ;;  %p463_p2 = scmp.lt.s32.totalorder %s457_s26, %s457_s26 }
   0x6   :  { %p464_p3 = por %p463_p2, %p462_p1 }
   0x8   :  { %p465_p4 = pnand %p464_p3, %p458_p0 }
   0xa   :  { %468 = shalt.err (!%p465_p4)
}
   0xb   :  { %23 = dma.hbm_to_vmem [thread:$0]  %s696_s0, 128, %s21_s25, [#allocation3]  }
   0xc   :  { %489 = dma.done.wait [#allocation3], 128  }
   0xd   :  { %490 = vsyncadd [#allocation3], 4294967168  ;;  %v494_v0 = vmov 0.0   ;;  %vm495_vm0 = vmmov 0   ;;  %v44_v1 = vld [vmem:[%s697_s1 + $0x8] sm:$0xff]  ;;  %v43_v2 = vld [vmem:[%s697_s1] sm:$0xff] }
   0xe   :  { %368 = vmatprep.subr.mxu0 %v494_v0  ;;  %372 = vmatprep.mubr.msk.f32.mxu0 %vm495_vm0, %v494_v0  ;;  %v39_v3 = vld [vmem:[#allocation2] sm:$0xff]  ;;  %vm51_vm1 = vcmask 130048   ;;  %v141_v4 = vld [vmem:[%s699_s3 + $0x78] sm:$0xff]  ;;  %v140_v5 = vld [vmem:[%s699_s3 + $0x70] sm:$0xff]  ;;  %s496_s25 = smov [#allocation5]  }
   0xf   :  { %375 = vmatprep.subr.mxu1 %v494_v0  ;;  %407 = vmatprep.mubr.msk.f32.mxu1 %vm495_vm0, %v494_v0  ;;  %v139_v6 = vld [vmem:[%s699_s3 + $0x68] sm:$0xff]  ;;  %v138_v7 = vld [vmem:[%s699_s3 + $0x60] sm:$0xff]  ;;  %v137_v8 = vld [vmem:[%s699_s3 + $0x58] sm:$0xff]  ;;  %s318_s26 = sshll.u32 %s496_s25, 4  ;;  %s319_s26 = int_to_ptr.vmem [resolvable:$true] %s318_s26 }
  0x10   :  { %369 = vmatpush3.msra.mxu0 %v44_v1  ;;  %376 = vmatpush3.msra.mxu1 %v141_v4  ;;  %v136_v9 = vld [vmem:[%s699_s3 + $0x50] sm:$0xff]  ;;  %v135_v10 = vld [vmem:[%s699_s3 + $0x48] sm:$0xff]  ;;  %v134_v11 = vld [vmem:[%s699_s3 + $0x40] sm:$0xff]  ;;  %p474_p6 = scmp.lt.s32.totalorder %s319_s26, %s319_s26 }
  0x11   :  { %370 = vmatprep.subr.mxu0 %v494_v0  ;;  %377 = vmatprep.subr.mxu1 %v494_v0  ;;  %v133_v12 = vld [vmem:[%s699_s3 + $0x38] sm:$0xff]  ;;  %v132_v13 = vld [vmem:[%s699_s3 + $0x30] sm:$0xff]  ;;  %v131_v14 = vld [vmem:[%s699_s3 + $0x28] sm:$0xff] }
  0x12   :  { %371 = vmatpush3.msra.mxu0 %v43_v2  ;;  %378 = vmatpush3.msra.mxu1 %v140_v5  ;;  %v130_v15 = vld [vmem:[%s699_s3 + $0x20] sm:$0xff]  ;;  %v129_v16 = vld [vmem:[%s699_s3 + $0x18] sm:$0xff]  ;;  %v128_v17 = vld [vmem:[%s699_s3 + $0x10] sm:$0xff] }
  0x13   :  { %373 = vmatmul.mubr.msk.f32.vlgmr.msra.gmra.mxu0 %vm51_vm1, %v39_v3  ;;  %379 = vmatprep.subr.mxu1 %v494_v0  ;;  %v127_v18 = vld [vmem:[%s699_s3 + $0x8] sm:$0xff]  ;;  %v126_v19 = vld [vmem:[%s699_s3] sm:$0xff]  ;;  %v234_v20 = vld [vmem:[%s701_s5 + $0x78] sm:$0xff] }
  0x14   :  { %410 = vmatprep.subr.mxu0 %v494_v0  ;;  %380 = vmatpush3.msra.mxu1 %v139_v6  ;;  %v233_v21 = vld [vmem:[%s701_s5 + $0x70] sm:$0xff]  ;;  %v232_v22 = vld [vmem:[%s701_s5 + $0x68] sm:$0xff]  ;;  %v231_v23 = vld [vmem:[%s701_s5 + $0x60] sm:$0xff] }
  0x15   :  { %442 = vmatprep.mubr.msk.f32.mxu0 %vm495_vm0, %v494_v0  ;;  %381 = vmatprep.subr.mxu1 %v494_v0  ;;  %v230_v24 = vld [vmem:[%s701_s5 + $0x58] sm:$0xff]  ;;  %v229_v25 = vld [vmem:[%s701_s5 + $0x50] sm:$0xff]  ;;  %v228_v26 = vld [vmem:[%s701_s5 + $0x48] sm:$0xff] }
  0x16   :  { %382 = vmatpush3.msra.mxu1 %v138_v7  ;;  %411 = vmatpush3.msra.mxu0 %v234_v20  ;;  %v227_v27 = vld [vmem:[%s701_s5 + $0x40] sm:$0xff]  ;;  %v226_v28 = vld [vmem:[%s701_s5 + $0x38] sm:$0xff]  ;;  %v225_v29 = vld [vmem:[%s701_s5 + $0x30] sm:$0xff] }
  0x17   :  { %383 = vmatprep.subr.mxu1 %v494_v0  ;;  %412 = vmatprep.subr.mxu0 %v494_v0  ;;  %v224_v30 = vld [vmem:[%s701_s5 + $0x28] sm:$0xff]  ;;  %v223_v31 = vld [vmem:[%s701_s5 + $0x20] sm:$0xff]  ;;  %v222_v32 = vld [vmem:[%s701_s5 + $0x18] sm:$0xff] }
  0x18   :  { %384 = vmatpush3.msra.mxu1 %v137_v8  ;;  %413 = vmatpush3.msra.mxu0 %v233_v21  ;;  %v327_v33 = vld [vmem:[%s698_s2] ss:$0 sm:$0xff]  ;;  %v221_v38 = vld [vmem:[%s701_s5 + $0x10] sm:$0xff]  ;;  %v220_v39 = vld [vmem:[%s701_s5 + $0x8] sm:$0xff] }
  0x19   :  { %385 = vmatprep.subr.mxu1 %v494_v0  ;;  %414 = vmatprep.subr.mxu0 %v494_v0  ;;  %v219_v40 = vld [vmem:[%s701_s5] sm:$0xff]  ;;  %s469_s5 = scalar_lea.vmem %s319_s26, 128 }
  0x1a   :  { %386 = vmatpush3.msra.mxu1 %v136_v9  ;;  %415 = vmatpush3.msra.mxu0 %v232_v22  ;;  %v329_v41 = vld [vmem:[%s700_s4] ss:$0 sm:$0xff]  ;;  %p470_p5 = scmp.ne.s32.totalorder %s319_s26, %s469_s5  ;;  %p475_p7 = scmp.lt.s32.totalorder %s469_s5, %s469_s5 }
  0x1b   :  { %387 = vmatprep.subr.mxu1 %v494_v0  ;;  %416 = vmatprep.subr.mxu0 %v494_v0  ;;  %v330_v46 = vld [vmem:[%s702_s6] ss:$0 sm:$0xff] }
  0x1c   :  { %388 = vmatpush3.msra.mxu1 %v135_v10  ;;  %417 = vmatpush3.msra.mxu0 %v231_v23  ;;  %p476_p8 = por %p475_p7, %p474_p6 }
  0x1d   :  { %389 = vmatprep.subr.mxu1 %v494_v0  ;;  %418 = vmatprep.subr.mxu0 %v494_v0 }
  0x1e   :  { %390 = vmatpush3.msra.mxu1 %v134_v11  ;;  %419 = vmatpush3.msra.mxu0 %v230_v24  ;;  %p477_p9 = pnand %p476_p8, %p470_p5 }
  0x1f   :  { %391 = vmatprep.subr.mxu1 %v494_v0  ;;  %420 = vmatprep.subr.mxu0 %v494_v0 }
  0x20   :  { %392 = vmatpush3.msra.mxu1 %v133_v12  ;;  %421 = vmatpush3.msra.mxu0 %v229_v25 }
  0x21   :  { %393 = vmatprep.subr.mxu1 %v494_v0  ;;  %422 = vmatprep.subr.mxu0 %v494_v0 }
  0x22   :  { %394 = vmatpush3.msra.mxu1 %v132_v13  ;;  %423 = vmatpush3.msra.mxu0 %v228_v26 }
  0x23   :  { %395 = vmatprep.subr.mxu1 %v494_v0  ;;  %424 = vmatprep.subr.mxu0 %v494_v0 }
  0x24   :  { %396 = vmatpush3.msra.mxu1 %v131_v14  ;;  %425 = vmatpush3.msra.mxu0 %v227_v27 }
  0x25   :  { %397 = vmatprep.subr.mxu1 %v494_v0  ;;  %426 = vmatprep.subr.mxu0 %v494_v0 }
  0x26   :  { %398 = vmatpush3.msra.mxu1 %v130_v15  ;;  %427 = vmatpush3.msra.mxu0 %v226_v28 }
  0x27   :  { %399 = vmatprep.subr.mxu1 %v494_v0  ;;  %428 = vmatprep.subr.mxu0 %v494_v0 }
  0x28   :  { %400 = vmatpush3.msra.mxu1 %v129_v16  ;;  %429 = vmatpush3.msra.mxu0 %v225_v29 }
  0x29   :  { %401 = vmatprep.subr.mxu1 %v494_v0  ;;  %430 = vmatprep.subr.mxu0 %v494_v0 }
  0x2a   :  { %402 = vmatpush3.msra.mxu1 %v128_v17  ;;  %431 = vmatpush3.msra.mxu0 %v224_v30 }
  0x2b   :  { %403 = vmatprep.subr.mxu1 %v494_v0  ;;  %432 = vmatprep.subr.mxu0 %v494_v0 }
  0x2c   :  { %404 = vmatpush3.msra.mxu1 %v127_v18  ;;  %433 = vmatpush3.msra.mxu0 %v223_v31 }
  0x2d   :  { %405 = vmatprep.subr.mxu1 %v494_v0  ;;  %434 = vmatprep.subr.mxu0 %v494_v0 }
  0x2e   :  { %406 = vmatpush3.msra.mxu1 %v126_v19  ;;  %435 = vmatpush3.msra.mxu0 %v222_v32 }
  0x2f   :  { %436 = vmatprep.subr.mxu0 %v494_v0 }
  0x30   :  { %437 = vmatpush3.msra.mxu0 %v221_v38 }
  0x31   :  { %438 = vmatprep.subr.mxu0 %v494_v0 }
  0x32   :  { %439 = vmatpush3.msra.mxu0 %v220_v39 }
  0x33   :  { %440 = vmatprep.subr.mxu0 %v494_v0 }
  0x34   :  { %441 = vmatpush3.msra.mxu0 %v219_v40 }
  0xd3   :  { %v121_v34 = vpop.f32.mrf.mxu0 }
  0xd4   :  { %v122_v35 = vadd.f32 %v327_v33, %v121_v34 }
  0xd5   :  { %v374_v36 = vpop.f32.mrf.mxu0 }
  0xd6   :  { %v125_v37 = vmax.f32 %v122_v35, 0.0 }
  0xd8   :  { %408 = vmatmul.mubr.f32.vlgmr.msra.gmra.mxu1 %v125_v37 }
 0x198   :  { %v214_v42 = vpop.f32.mrf.mxu1 }
 0x199   :  { %v215_v43 = vadd.f32 %v329_v41, %v214_v42 }
 0x19a   :  { %v409_v44 = vpop.f32.mrf.mxu1 }
 0x19b   :  { %v218_v45 = vmax.f32 %v215_v43, 0.0 }
 0x19d   :  { %443 = vmatmul.mubr.f32.vlgmr.msra.gmra.mxu0 %v218_v45 }
 0x25d   :  { %v307_v47 = vpop.f32.mrf.mxu0 }
 0x25e   :  { %v308_v48 = vadd.f32 %v330_v46, %v307_v47 }
 0x25f   :  { %v444_v49 = vpop.f32.mrf.mxu0 }
 0x260   :  { %311 = vst.msk [vmem:[#allocation5] sm:$0xff] %vm51_vm1, %v308_v48 }
 0x261   :  { %480 = shalt.err (!%p477_p9)
}
 0x262   :  { %321 = dma.vmem_to_hbm [thread:$0]  %s319_s26, 128, %s703_s7, [#allocation4]  }
 0x263   :  { %491 = dma.done.wait [#allocation4], 128  }
 0x264   :  { %492 = vsyncadd [#allocation4], 4294967168 }
 0x265   :  { %325 = vsyncpa [#allocation3], 1 }
 0x266   :  { %326 = vsyncpa [#allocation4], 1 }

// kernel: tpu_custom_call.1
= control target key start
LH: loop header
LB: loop body
LE: loop exit
PB: predicated region body
PF: predicated region fallthrough
CT: control target
= control target key end

     0   :  { %12 = vsyncpa [#allocation3], 0  ;;  %s696_s0 = inlined_call_operand.hbm [shape: f32[8,16], index: 0, kind: input, shape index: {}]   ;;  %s697_s1 = inlined_call_operand.vmem [shape: f32[16,128], index: 1, kind: input, shape index: {}]   ;;  %s698_s2 = inlined_call_operand.vmem [shape: f32[1,128], index: 2, kind: input, shape index: {}]   ;;  %s699_s3 = inlined_call_operand.vmem [shape: f32[128,128], index: 3, kind: input, shape index: {}]   ;;  %s700_s4 = inlined_call_operand.vmem [shape: f32[1,128], index: 4, kind: input, shape index: {}]   ;;  %s701_s5 = inlined_call_operand.vmem [shape: f32[128,16], index: 5, kind: input, shape index: {}]   ;;  %s702_s6 = inlined_call_operand.vmem [shape: f32[1,16], index: 6, kind: input, shape index: {}]   ;;  %s703_s7 = inlined_call_operand.hbm [shape: f32[8,16], index: 7, kind: output, shape index: {}]  }
   0x1   :  { %13 = vsyncpa [#allocation4], 0  ;;  %s493_s24 = smov [#allocation2]  }
   0x2   :  { %s20_s25 = sshll.u32 %s493_s24, 4  ;;  %s21_s25 = int_to_ptr.vmem [resolvable:$true] %s20_s25 }
   0x3   :  { %s457_s26 = scalar_lea.vmem %s21_s25, 128  ;;  %p462_p1 = scmp.lt.s32.totalorder %s21_s25, %s21_s25 }
   0x4   :  { %p458_p0 = scmp.ne.s32.totalorder %s21_s25, %s457_s26  ;;  %p463_p2 = scmp.lt.s32.totalorder %s457_s26, %s457_s26 }
   0x6   :  { %p464_p3 = por %p463_p2, %p462_p1 }
   0x8   :  { %p465_p4 = pnand %p464_p3, %p458_p0 }
   0xa   :  { %468 = shalt.err (!%p465_p4)
}
   0xb   :  { %23 = dma.hbm_to_vmem [thread:$0]  %s696_s0, 128, %s21_s25, [#allocation3]  }
   0xc   :  { %489 = dma.done.wait [#allocation3], 128  }
   0xd   :  { %490 = vsyncadd [#allocation3], 4294967168  ;;  %v494_v0 = vmov 0.0   ;;  %vm495_vm0 = vmmov 0   ;;  %v44_v1 = vld [vmem:[%s697_s1 + $0x8] sm:$0xff]  ;;  %v43_v2 = vld [vmem:[%s697_s1] sm:$0xff] }
   0xe   :  { %368 = vmatprep.subr.mxu0 %v494_v0  ;;  %372 = vmatprep.mubr.msk.f32.mxu0 %vm495_vm0, %v494_v0  ;;  %v39_v3 = vld [vmem:[#allocation2] sm:$0xff]  ;;  %vm51_vm1 = vcmask 130048   ;;  %v141_v4 = vld [vmem:[%s699_s3 + $0x78] sm:$0xff]  ;;  %v140_v5 = vld [vmem:[%s699_s3 + $0x70] sm:$0xff]  ;;  %s496_s25 = smov [#allocation5]  }
   0xf   :  { %375 = vmatprep.subr.mxu1 %v494_v0  ;;  %407 = vmatprep.mubr.msk.f32.mxu1 %vm495_vm0, %v494_v0  ;;  %v139_v6 = vld [vmem:[%s699_s3 + $0x68] sm:$0xff]  ;;  %v138_v7 = vld [vmem:[%s699_s3 + $0x60] sm:$0xff]  ;;  %v137_v8 = vld [vmem:[%s699_s3 + $0x58] sm:$0xff]  ;;  %s318_s26 = sshll.u32 %s496_s25, 4  ;;  %s319_s26 = int_to_ptr.vmem [resolvable:$true] %s318_s26 }
  0x10   :  { %369 = vmatpush3.msra.mxu0 %v44_v1  ;;  %376 = vmatpush3.msra.mxu1 %v141_v4  ;;  %v136_v9 = vld [vmem:[%s699_s3 + $0x50] sm:$0xff]  ;;  %v135_v10 = vld [vmem:[%s699_s3 + $0x48] sm:$0xff]  ;;  %v134_v11 = vld [vmem:[%s699_s3 + $0x40] sm:$0xff]  ;;  %p474_p6 = scmp.lt.s32.totalorder %s319_s26, %s319_s26 }
  0x11   :  { %370 = vmatprep.subr.mxu0 %v494_v0  ;;  %377 = vmatprep.subr.mxu1 %v494_v0  ;;  %v133_v12 = vld [vmem:[%s699_s3 + $0x38] sm:$0xff]  ;;  %v132_v13 = vld [vmem:[%s699_s3 + $0x30] sm:$0xff]  ;;  %v131_v14 = vld [vmem:[%s699_s3 + $0x28] sm:$0xff] }
  0x12   :  { %371 = vmatpush3.msra.mxu0 %v43_v2  ;;  %378 = vmatpush3.msra.mxu1 %v140_v5  ;;  %v130_v15 = vld [vmem:[%s699_s3 + $0x20] sm:$0xff]  ;;  %v129_v16 = vld [vmem:[%s699_s3 + $0x18] sm:$0xff]  ;;  %v128_v17 = vld [vmem:[%s699_s3 + $0x10] sm:$0xff] }
  0x13   :  { %373 = vmatmul.mubr.msk.f32.vlgmr.msra.gmra.mxu0 %vm51_vm1, %v39_v3  ;;  %379 = vmatprep.subr.mxu1 %v494_v0  ;;  %v127_v18 = vld [vmem:[%s699_s3 + $0x8] sm:$0xff]  ;;  %v126_v19 = vld [vmem:[%s699_s3] sm:$0xff]  ;;  %v234_v20 = vld [vmem:[%s701_s5 + $0x78] sm:$0xff] }
  0x14   :  { %410 = vmatprep.subr.mxu0 %v494_v0  ;;  %380 = vmatpush3.msra.mxu1 %v139_v6  ;;  %v233_v21 = vld [vmem:[%s701_s5 + $0x70] sm:$0xff]  ;;  %v232_v22 = vld [vmem:[%s701_s5 + $0x68] sm:$0xff]  ;;  %v231_v23 = vld [vmem:[%s701_s5 + $0x60] sm:$0xff] }
  0x15   :  { %442 = vmatprep.mubr.msk.f32.mxu0 %vm495_vm0, %v494_v0  ;;  %381 = vmatprep.subr.mxu1 %v494_v0  ;;  %v230_v24 = vld [vmem:[%s701_s5 + $0x58] sm:$0xff]  ;;  %v229_v25 = vld [vmem:[%s701_s5 + $0x50] sm:$0xff]  ;;  %v228_v26 = vld [vmem:[%s701_s5 + $0x48] sm:$0xff] }
  0x16   :  { %382 = vmatpush3.msra.mxu1 %v138_v7  ;;  %411 = vmatpush3.msra.mxu0 %v234_v20  ;;  %v227_v27 = vld [vmem:[%s701_s5 + $0x40] sm:$0xff]  ;;  %v226_v28 = vld [vmem:[%s701_s5 + $0x38] sm:$0xff]  ;;  %v225_v29 = vld [vmem:[%s701_s5 + $0x30] sm:$0xff] }
  0x17   :  { %383 = vmatprep.subr.mxu1 %v494_v0  ;;  %412 = vmatprep.subr.mxu0 %v494_v0  ;;  %v224_v30 = vld [vmem:[%s701_s5 + $0x28] sm:$0xff]  ;;  %v223_v31 = vld [vmem:[%s701_s5 + $0x20] sm:$0xff]  ;;  %v222_v32 = vld [vmem:[%s701_s5 + $0x18] sm:$0xff] }
  0x18   :  { %384 = vmatpush3.msra.mxu1 %v137_v8  ;;  %413 = vmatpush3.msra.mxu0 %v233_v21  ;;  %v327_v33 = vld [vmem:[%s698_s2] ss:$0 sm:$0xff]  ;;  %v221_v38 = vld [vmem:[%s701_s5 + $0x10] sm:$0xff]  ;;  %v220_v39 = vld [vmem:[%s701_s5 + $0x8] sm:$0xff] }
  0x19   :  { %385 = vmatprep.subr.mxu1 %v494_v0  ;;  %414 = vmatprep.subr.mxu0 %v494_v0  ;;  %v219_v40 = vld [vmem:[%s701_s5] sm:$0xff]  ;;  %s469_s5 = scalar_lea.vmem %s319_s26, 128 }
  0x1a   :  { %386 = vmatpush3.msra.mxu1 %v136_v9  ;;  %415 = vmatpush3.msra.mxu0 %v232_v22  ;;  %v329_v41 = vld [vmem:[%s700_s4] ss:$0 sm:$0xff]  ;;  %p470_p5 = scmp.ne.s32.totalorder %s319_s26, %s469_s5  ;;  %p475_p7 = scmp.lt.s32.totalorder %s469_s5, %s469_s5 }
  0x1b   :  { %387 = vmatprep.subr.mxu1 %v494_v0  ;;  %416 = vmatprep.subr.mxu0 %v494_v0  ;;  %v330_v46 = vld [vmem:[%s702_s6] ss:$0 sm:$0xff] }
  0x1c   :  { %388 = vmatpush3.msra.mxu1 %v135_v10  ;;  %417 = vmatpush3.msra.mxu0 %v231_v23  ;;  %p476_p8 = por %p475_p7, %p474_p6 }
  0x1d   :  { %389 = vmatprep.subr.mxu1 %v494_v0  ;;  %418 = vmatprep.subr.mxu0 %v494_v0 }
  0x1e   :  { %390 = vmatpush3.msra.mxu1 %v134_v11  ;;  %419 = vmatpush3.msra.mxu0 %v230_v24  ;;  %p477_p9 = pnand %p476_p8, %p470_p5 }
  0x1f   :  { %391 = vmatprep.subr.mxu1 %v494_v0  ;;  %420 = vmatprep.subr.mxu0 %v494_v0 }
  0x20   :  { %392 = vmatpush3.msra.mxu1 %v133_v12  ;;  %421 = vmatpush3.msra.mxu0 %v229_v25 }
  0x21   :  { %393 = vmatprep.subr.mxu1 %v494_v0  ;;  %422 = vmatprep.subr.mxu0 %v494_v0 }
  0x22   :  { %394 = vmatpush3.msra.mxu1 %v132_v13  ;;  %423 = vmatpush3.msra.mxu0 %v228_v26 }
  0x23   :  { %395 = vmatprep.subr.mxu1 %v494_v0  ;;  %424 = vmatprep.subr.mxu0 %v494_v0 }
  0x24   :  { %396 = vmatpush3.msra.mxu1 %v131_v14  ;;  %425 = vmatpush3.msra.mxu0 %v227_v27 }
  0x25   :  { %397 = vmatprep.subr.mxu1 %v494_v0  ;;  %426 = vmatprep.subr.mxu0 %v494_v0 }
  0x26   :  { %398 = vmatpush3.msra.mxu1 %v130_v15  ;;  %427 = vmatpush3.msra.mxu0 %v226_v28 }
  0x27   :  { %399 = vmatprep.subr.mxu1 %v494_v0  ;;  %428 = vmatprep.subr.mxu0 %v494_v0 }
  0x28   :  { %400 = vmatpush3.msra.mxu1 %v129_v16  ;;  %429 = vmatpush3.msra.mxu0 %v225_v29 }
  0x29   :  { %401 = vmatprep.subr.mxu1 %v494_v0  ;;  %430 = vmatprep.subr.mxu0 %v494_v0 }
  0x2a   :  { %402 = vmatpush3.msra.mxu1 %v128_v17  ;;  %431 = vmatpush3.msra.mxu0 %v224_v30 }
  0x2b   :  { %403 = vmatprep.subr.mxu1 %v494_v0  ;;  %432 = vmatprep.subr.mxu0 %v494_v0 }
  0x2c   :  { %404 = vmatpush3.msra.mxu1 %v127_v18  ;;  %433 = vmatpush3.msra.mxu0 %v223_v31 }
  0x2d   :  { %405 = vmatprep.subr.mxu1 %v494_v0  ;;  %434 = vmatprep.subr.mxu0 %v494_v0 }
  0x2e   :  { %406 = vmatpush3.msra.mxu1 %v126_v19  ;;  %435 = vmatpush3.msra.mxu0 %v222_v32 }
  0x2f   :  { %436 = vmatprep.subr.mxu0 %v494_v0 }
  0x30   :  { %437 = vmatpush3.msra.mxu0 %v221_v38 }
  0x31   :  { %438 = vmatprep.subr.mxu0 %v494_v0 }
  0x32   :  { %439 = vmatpush3.msra.mxu0 %v220_v39 }
  0x33   :  { %440 = vmatprep.subr.mxu0 %v494_v0 }
  0x34   :  { %441 = vmatpush3.msra.mxu0 %v219_v40 }
  0xd3   :  { %v121_v34 = vpop.f32.mrf.mxu0 }
  0xd4   :  { %v122_v35 = vadd.f32 %v327_v33, %v121_v34 }
  0xd5   :  { %v374_v36 = vpop.f32.mrf.mxu0 }
  0xd6   :  { %v125_v37 = vmax.f32 %v122_v35, 0.0 }
  0xd8   :  { %408 = vmatmul.mubr.f32.vlgmr.msra.gmra.mxu1 %v125_v37 }
 0x198   :  { %v214_v42 = vpop.f32.mrf.mxu1 }
 0x199   :  { %v215_v43 = vadd.f32 %v329_v41, %v214_v42 }
 0x19a   :  { %v409_v44 = vpop.f32.mrf.mxu1 }
 0x19b   :  { %v218_v45 = vmax.f32 %v215_v43, 0.0 }
 0x19d   :  { %443 = vmatmul.mubr.f32.vlgmr.msra.gmra.mxu0 %v218_v45 }
 0x25d   :  { %v307_v47 = vpop.f32.mrf.mxu0 }
 0x25e   :  { %v308_v48 = vadd.f32 %v330_v46, %v307_v47 }
 0x25f   :  { %v444_v49 = vpop.f32.mrf.mxu0 }
 0x260   :  { %311 = vst.msk [vmem:[#allocation5] sm:$0xff] %vm51_vm1, %v308_v48 }
 0x261   :  { %480 = shalt.err (!%p477_p9)
}
 0x262   :  { %321 = dma.vmem_to_hbm [thread:$0]  %s319_s26, 128, %s703_s7, [#allocation4]  }
 0x263   :  { %491 = dma.done.wait [#allocation4], 128  }
 0x264   :  { %492 = vsyncadd [#allocation4], 4294967168 }
 0x265   :  { %325 = vsyncpa [#allocation3], 1 }
 0x266   :  { %326 = vsyncpa [#allocation4], 1 }

</bundles_post_ra>
